<compile_context>
chip_gen: v7x
topology: tpu7x:2x2x1
jax: 0.10.0
libtpu: 0.0.40
codegen_flags: <defaults>
</compile_context>

<pallas_src>
import jax
import jax.numpy as jnp
from jax.experimental import pallas as pl
from jax.experimental.pallas import tpu as pltpu


def _round_up(x, m):
    return ((x + m - 1) // m) * m


def _pad_to(x, target, axis):
    pad = target - x.shape[axis]
    if pad == 0:
        return x
    widths = [(0, 0)] * x.ndim
    widths[axis] = (0, pad)
    return jnp.pad(x, widths)


def _mlp_kernel(x_ref, w1_ref, b1_ref, w2_ref, b2_ref, w3_ref, b3_ref,
                w4_ref, b4_ref, o_ref):
    # Layer 1: Linear(in -> M) + ReLU   (bf16 matmul, f32 accumulate/epilogue)
    h = jnp.dot(x_ref[...], w1_ref[...], preferred_element_type=jnp.float32)
    h = jnp.maximum(h + b1_ref[...], 0.0).astype(jnp.bfloat16)
    # Layer 2: Linear(M -> M) + ReLU
    h = jnp.dot(h, w2_ref[...], preferred_element_type=jnp.float32)
    h = jnp.maximum(h + b2_ref[...], 0.0).astype(jnp.bfloat16)
    # Layer 3: Linear(M -> M) + ReLU
    h = jnp.dot(h, w3_ref[...], preferred_element_type=jnp.float32)
    h = jnp.maximum(h + b3_ref[...], 0.0).astype(jnp.bfloat16)
    # Layer 4: Linear(M -> in), no activation
    out = jnp.dot(h, w4_ref[...], preferred_element_type=jnp.float32) + b4_ref[...]
    o_ref[...] = out.astype(o_ref.dtype)


def nonlinear_net_forward(u, params, p, tm=None):
    """u: (B, 2, p, p) float32 -> (B, 2, p, p) float32."""
    B = u.shape[0]
    in_dim = 2 * p * p
    x = u.reshape(B, in_dim)                       # same row-major order as torch .view

    w1, b1, w2, b2, w3, b3, w4, b4 = params
    M = w1.shape[1]

    # Pad feature / hidden dims to lane width (128) so loads/stores are
    # lane-dense (no masked vst); padded rows/cols are zero so results match.
    in_p = _round_up(in_dim, 128)
    M_p = _round_up(M, 128)

    # Batch tile: 256 rows matches the v6e/v7x MXU (128-multiple for v5e);
    # for tiny B use a single 16-row tile (bf16 sublane packing).
    if tm is None:
        tm = 256 if B >= 256 else max(16, _round_up(B, 16))
    B_p = _round_up(B, tm)
    nb = B_p // tm

    # bf16 matmul operands, f32 biases.
    xp = _pad_to(_pad_to(x, in_p, 1), B_p, 0).astype(jnp.bfloat16)
    w1p = _pad_to(_pad_to(w1, in_p, 0), M_p, 1).astype(jnp.bfloat16)
    w2p = _pad_to(_pad_to(w2, M_p, 0), M_p, 1).astype(jnp.bfloat16)
    w3p = _pad_to(_pad_to(w3, M_p, 0), M_p, 1).astype(jnp.bfloat16)
    w4p = _pad_to(_pad_to(w4, M_p, 0), in_p, 1).astype(jnp.bfloat16)
    b1p = _pad_to(b1, M_p, 1).astype(jnp.float32)
    b2p = _pad_to(b2, M_p, 1).astype(jnp.float32)
    b3p = _pad_to(b3, M_p, 1).astype(jnp.float32)
    b4p = _pad_to(b4, in_p, 1).astype(jnp.float32)

    # Weights/biases stay VMEM-resident across batch tiles (index_map -> (0, 0)).
    resident = lambda shape: pl.BlockSpec(shape, lambda i: (0, 0))

    flops = 2 * B_p * (in_p * M_p + 2 * M_p * M_p + M_p * in_p)
    bytes_accessed = (
        xp.size * 2
        + (w1p.size + w2p.size + w3p.size + w4p.size) * 2
        + (b1p.size + b2p.size + b3p.size + b4p.size) * 4
        + B_p * in_p * 4)

    out = pl.pallas_call(
        _mlp_kernel,
        out_shape=jax.ShapeDtypeStruct((B_p, in_p), jnp.float32),
        grid_spec=pltpu.PrefetchScalarGridSpec(
            num_scalar_prefetch=0,
            grid=(nb,),
            in_specs=[
                pl.BlockSpec((tm, in_p), lambda i: (i, 0)),   # x tile, pipelined
                resident((in_p, M_p)), resident((1, M_p)),
                resident((M_p, M_p)),  resident((1, M_p)),
                resident((M_p, M_p)),  resident((1, M_p)),
                resident((M_p, in_p)), resident((1, in_p)),
            ],
            out_specs=pl.BlockSpec((tm, in_p), lambda i: (i, 0)),
        ),
        compiler_params=pltpu.CompilerParams(
            dimension_semantics=("parallel",),       # batch tiles over 2 TCs on v7x
            vmem_limit_bytes=48 << 20,               # safe on v7x (64 MiB physical)
        ),
        cost_estimate=pl.CostEstimate(
            flops=flops, transcendentals=0, bytes_accessed=bytes_accessed),
    )(xp, w1p, b1p, w2p, b2p, w3p, b3p, w4p, b4p)

    out = out[:B, :in_dim]
    return out.reshape(B, 2, p, p)


def init_params(key, p, M):
    """Deterministic init matching nn.Linear shapes (weights stored transposed)."""
    in_dim = 2 * p * p
    dims = [(in_dim, M), (M, M), (M, M), (M, in_dim)]
    params = []
    for fan_in, fan_out in dims:
        key, kw, kb = jax.random.split(key, 3)
        bound = 1.0 / jnp.sqrt(fan_in)
        w = jax.random.uniform(kw, (fan_in, fan_out), jnp.float32, -bound, bound)
        b = jax.random.uniform(kb, (1, fan_out), jnp.float32, -bound, bound)
        params += [w, b]
    return params


def _reference(u, params, p):
    w1, b1, w2, b2, w3, b3, w4, b4 = params
    x = u.reshape(u.shape[0], -1)
    h = jnp.maximum(x @ w1 + b1, 0.0)
    h = jnp.maximum(h @ w2 + b2, 0.0)
    h = jnp.maximum(h @ w3 + b3, 0.0)
    y = h @ w4 + b4
    return y.reshape(u.shape[0], 2, p, p)


if __name__ == "__main__":
    # Small, TPU-friendly shapes consistent with the module's forward:
    # batch=2, p=8 (so p*p*2 = 128), hidden M=256.
    B, P, M_HIDDEN = 2, 8, 256

    key = jax.random.PRNGKey(0)
    key, ku = jax.random.split(key)
    u = jax.random.normal(ku, (B, 2, P, P), dtype=jnp.float32)

    params = init_params(key, P, M_HIDDEN)

    out = nonlinear_net_forward(u, params, P)
    out = jax.block_until_ready(out)

    ref = _reference(u, params, P)
    assert out.shape == (B, 2, P, P)
    # bf16 matmul inputs with f32 accumulation -> small deviation vs f32 ref.
    assert jnp.allclose(out, ref, rtol=2e-2, atol=2e-2), "mismatch vs JAX reference"

    print("KERNEL_OK")
</pallas_src>

<mosaic_0001>
module attributes {stable_mosaic.version = 11 : i64} {
  func.func @_mlp_kernel(%arg0: i32, %arg1: memref<16x128xbf16, #tpu.memory_space<vmem>>, %arg2: memref<128x256xbf16, #tpu.memory_space<vmem>>, %arg3: memref<1x256xf32, #tpu.memory_space<vmem>>, %arg4: memref<256x256xbf16, #tpu.memory_space<vmem>>, %arg5: memref<1x256xf32, #tpu.memory_space<vmem>>, %arg6: memref<256x256xbf16, #tpu.memory_space<vmem>>, %arg7: memref<1x256xf32, #tpu.memory_space<vmem>>, %arg8: memref<256x128xbf16, #tpu.memory_space<vmem>>, %arg9: memref<1x128xf32, #tpu.memory_space<vmem>>, %arg10: memref<16x128xf32, #tpu.memory_space<vmem>>) attributes {dimension_semantics = [#tpu.dimension_semantics<parallel>], iteration_bounds = array<i64: 1>, scalar_prefetch = 0 : i64, scratch_operands = 0 : i64, tpu.core_type = #tpu.core_type<tc>, window_params = [{transform_indices = @transform_0, window_bounds = array<i64: 16, 128>}, {pipeline_mode = #tpu.pipeline_mode<synchronous>, transform_indices = @transform_1, window_bounds = array<i64: 128, 256>}, {pipeline_mode = #tpu.pipeline_mode<synchronous>, transform_indices = @transform_2, window_bounds = array<i64: 1, 256>}, {pipeline_mode = #tpu.pipeline_mode<synchronous>, transform_indices = @transform_3, window_bounds = array<i64: 256, 256>}, {pipeline_mode = #tpu.pipeline_mode<synchronous>, transform_indices = @transform_4, window_bounds = array<i64: 1, 256>}, {pipeline_mode = #tpu.pipeline_mode<synchronous>, transform_indices = @transform_5, window_bounds = array<i64: 256, 256>}, {pipeline_mode = #tpu.pipeline_mode<synchronous>, transform_indices = @transform_6, window_bounds = array<i64: 1, 256>}, {pipeline_mode = #tpu.pipeline_mode<synchronous>, transform_indices = @transform_7, window_bounds = array<i64: 256, 128>}, {pipeline_mode = #tpu.pipeline_mode<synchronous>, transform_indices = @transform_8, window_bounds = array<i64: 1, 128>}, {transform_indices = @transform_9, window_bounds = array<i64: 16, 128>}]} {
    %c0 = arith.constant 0 : index
    %c0_0 = arith.constant 0 : index
    %0 = vector.load %arg1[%c0, %c0_0] : memref<16x128xbf16, #tpu.memory_space<vmem>>, vector<16x128xbf16>
    %c0_1 = arith.constant 0 : index
    %c0_2 = arith.constant 0 : index
    %1 = vector.load %arg2[%c0_1, %c0_2] : memref<128x256xbf16, #tpu.memory_space<vmem>>, vector<128x256xbf16>
    %cst = arith.constant dense<0.000000e+00> : vector<16x256xf32>
    %2 = tpu.matmul %0, %1, %cst {dimension_numbers = #tpu.dot_dimension_numbers<[1], [0], [0], [1], [0, 0, 1, 1], [], []>} : vector<16x128xbf16>, vector<128x256xbf16>, vector<16x256xf32> -> vector<16x256xf32>
    %c0_3 = arith.constant 0 : index
    %c0_4 = arith.constant 0 : index
    %3 = vector.load %arg3[%c0_3, %c0_4] : memref<1x256xf32, #tpu.memory_space<vmem>>, vector<1x256xf32>
    %4 = vector.broadcast %3 : vector<1x256xf32> to vector<16x256xf32>
    %5 = arith.addf %2, %4 : vector<16x256xf32>
    %cst_5 = arith.constant 0.000000e+00 : f32
    %6 = vector.broadcast %cst_5 : f32 to vector<16x256xf32>
    %7 = arith.maximumf %5, %6 : vector<16x256xf32>
    %8 = arith.truncf %7 : vector<16x256xf32> to vector<16x256xbf16>
    %c0_6 = arith.constant 0 : index
    %c0_7 = arith.constant 0 : index
    %9 = vector.load %arg4[%c0_6, %c0_7] : memref<256x256xbf16, #tpu.memory_space<vmem>>, vector<256x256xbf16>
    %cst_8 = arith.constant dense<0.000000e+00> : vector<16x256xf32>
    %10 = tpu.matmul %8, %9, %cst_8 {dimension_numbers = #tpu.dot_dimension_numbers<[1], [0], [0], [1], [0, 0, 1, 1], [], []>} : vector<16x256xbf16>, vector<256x256xbf16>, vector<16x256xf32> -> vector<16x256xf32>
    %c0_9 = arith.constant 0 : index
    %c0_10 = arith.constant 0 : index
    %11 = vector.load %arg5[%c0_9, %c0_10] : memref<1x256xf32, #tpu.memory_space<vmem>>, vector<1x256xf32>
    %12 = vector.broadcast %11 : vector<1x256xf32> to vector<16x256xf32>
    %13 = arith.addf %10, %12 : vector<16x256xf32>
    %cst_11 = arith.constant 0.000000e+00 : f32
    %14 = vector.broadcast %cst_11 : f32 to vector<16x256xf32>
    %15 = arith.maximumf %13, %14 : vector<16x256xf32>
    %16 = arith.truncf %15 : vector<16x256xf32> to vector<16x256xbf16>
    %c0_12 = arith.constant 0 : index
    %c0_13 = arith.constant 0 : index
    %17 = vector.load %arg6[%c0_12, %c0_13] : memref<256x256xbf16, #tpu.memory_space<vmem>>, vector<256x256xbf16>
    %cst_14 = arith.constant dense<0.000000e+00> : vector<16x256xf32>
    %18 = tpu.matmul %16, %17, %cst_14 {dimension_numbers = #tpu.dot_dimension_numbers<[1], [0], [0], [1], [0, 0, 1, 1], [], []>} : vector<16x256xbf16>, vector<256x256xbf16>, vector<16x256xf32> -> vector<16x256xf32>
    %c0_15 = arith.constant 0 : index
    %c0_16 = arith.constant 0 : index
    %19 = vector.load %arg7[%c0_15, %c0_16] : memref<1x256xf32, #tpu.memory_space<vmem>>, vector<1x256xf32>
    %20 = vector.broadcast %19 : vector<1x256xf32> to vector<16x256xf32>
    %21 = arith.addf %18, %20 : vector<16x256xf32>
    %cst_17 = arith.constant 0.000000e+00 : f32
    %22 = vector.broadcast %cst_17 : f32 to vector<16x256xf32>
    %23 = arith.maximumf %21, %22 : vector<16x256xf32>
    %24 = arith.truncf %23 : vector<16x256xf32> to vector<16x256xbf16>
    %c0_18 = arith.constant 0 : index
    %c0_19 = arith.constant 0 : index
    %25 = vector.load %arg8[%c0_18, %c0_19] : memref<256x128xbf16, #tpu.memory_space<vmem>>, vector<256x128xbf16>
    %cst_20 = arith.constant dense<0.000000e+00> : vector<16x128xf32>
    %26 = tpu.matmul %24, %25, %cst_20 {dimension_numbers = #tpu.dot_dimension_numbers<[1], [0], [0], [1], [0, 0, 1, 1], [], []>} : vector<16x256xbf16>, vector<256x128xbf16>, vector<16x128xf32> -> vector<16x128xf32>
    %c0_21 = arith.constant 0 : index
    %c0_22 = arith.constant 0 : index
    %27 = vector.load %arg9[%c0_21, %c0_22] : memref<1x128xf32, #tpu.memory_space<vmem>>, vector<1x128xf32>
    %28 = vector.broadcast %27 : vector<1x128xf32> to vector<16x128xf32>
    %29 = arith.addf %26, %28 : vector<16x128xf32>
    %c0_23 = arith.constant 0 : index
    %c0_24 = arith.constant 0 : index
    %30 = vector.load %arg10[%c0_23, %c0_24] : memref<16x128xf32, #tpu.memory_space<vmem>>, vector<16x128xf32>
    tpu.vector_store %arg10[%c0_23, %c0_24], %29 {strides = array<i32>} : memref<16x128xf32, #tpu.memory_space<vmem>>, vector<16x128xf32>,
    return
  }
  func.func @transform_0(%arg0: i32) -> (i32, i32) {
    %c0_i32 = arith.constant 0 : i32
    %c0_i32_0 = arith.constant 0 : i32
    return %arg0, %c0_i32 : i32, i32
  }
  func.func @transform_1(%arg0: i32) -> (i32, i32) {
    %c0_i32 = arith.constant 0 : i32
    %c0_i32_0 = arith.constant 0 : i32
    %c0_i32_1 = arith.constant 0 : i32
    return %c0_i32, %c0_i32_0 : i32, i32
  }
  func.func @transform_2(%arg0: i32) -> (i32, i32) {
    %c0_i32 = arith.constant 0 : i32
    %c0_i32_0 = arith.constant 0 : i32
    %c0_i32_1 = arith.constant 0 : i32
    return %c0_i32, %c0_i32_0 : i32, i32
  }
  func.func @transform_3(%arg0: i32) -> (i32, i32) {
    %c0_i32 = arith.constant 0 : i32
    %c0_i32_0 = arith.constant 0 : i32
    %c0_i32_1 = arith.constant 0 : i32
    return %c0_i32, %c0_i32_0 : i32, i32
  }
  func.func @transform_4(%arg0: i32) -> (i32, i32) {
    %c0_i32 = arith.constant 0 : i32
    %c0_i32_0 = arith.constant 0 : i32
    %c0_i32_1 = arith.constant 0 : i32
    return %c0_i32, %c0_i32_0 : i32, i32
  }
  func.func @transform_5(%arg0: i32) -> (i32, i32) {
    %c0_i32 = arith.constant 0 : i32
    %c0_i32_0 = arith.constant 0 : i32
    %c0_i32_1 = arith.constant 0 : i32
    return %c0_i32, %c0_i32_0 : i32, i32
  }
  func.func @transform_6(%arg0: i32) -> (i32, i32) {
    %c0_i32 = arith.constant 0 : i32
    %c0_i32_0 = arith.constant 0 : i32
    %c0_i32_1 = arith.constant 0 : i32
    return %c0_i32, %c0_i32_0 : i32, i32
  }
  func.func @transform_7(%arg0: i32) -> (i32, i32) {
    %c0_i32 = arith.constant 0 : i32
    %c0_i32_0 = arith.constant 0 : i32
    %c0_i32_1 = arith.constant 0 : i32
    return %c0_i32, %c0_i32_0 : i32, i32
  }
  func.func @transform_8(%arg0: i32) -> (i32, i32) {
    %c0_i32 = arith.constant 0 : i32
    %c0_i32_0 = arith.constant 0 : i32
    %c0_i32_1 = arith.constant 0 : i32
    return %c0_i32, %c0_i32_0 : i32, i32
  }
  func.func @transform_9(%arg0: i32) -> (i32, i32) {
    %c0_i32 = arith.constant 0 : i32
    %c0_i32_0 = arith.constant 0 : i32
    return %arg0, %c0_i32 : i32, i32
  }
}

</mosaic_0001>

<bundles_post_ra>
// kernel: tpu_custom_call.1
= control target key start
LH: loop header
LB: loop body
LE: loop exit
PB: predicated region body
PF: predicated region fallthrough
CT: control target
= control target key end

     0   :  { %14 = vsyncpa [#allocation3], 0  ;;  %s1551_s0 = inlined_call_operand.hbm [shape: bf16[16,128], index: 0, kind: input, shape index: {}]   ;;  %s1552_s1 = inlined_call_operand.hbm [shape: bf16[128,256], index: 1, kind: input, shape index: {}]   ;;  %s1553_s2 = inlined_call_operand.vmem [shape: f32[1,256], index: 2, kind: input, shape index: {}]   ;;  %s1554_s3 = inlined_call_operand.hbm [shape: bf16[256,256], index: 3, kind: input, shape index: {}]   ;;  %s1555_s4 = inlined_call_operand.vmem [shape: f32[1,256], index: 4, kind: input, shape index: {}]   ;;  %s1556_s5 = inlined_call_operand.hbm [shape: bf16[256,256], index: 5, kind: input, shape index: {}]   ;;  %s1557_s6 = inlined_call_operand.vmem [shape: f32[1,256], index: 6, kind: input, shape index: {}]   ;;  %s1558_s7 = inlined_call_operand.hbm [shape: bf16[256,128], index: 7, kind: input, shape index: {}]   ;;  %s1559_s8 = inlined_call_operand.vmem [shape: f32[1,128], index: 8, kind: input, shape index: {}]   ;;  %s1560_s9 = inlined_call_operand.hbm [shape: f32[16,128], index: 9, kind: output, shape index: {}]  }
   0x1   :  { %15 = vsyncpa [#allocation6], 0 }
   0x2   :  { %16 = vsyncpa [#allocation9], 0 }
   0x3   :  { %17 = vsyncpa [#allocation4], 0  ;;  %s1378_s30 = smov [#allocation5]   ;;  %s1238_s13 = scalar_lea.hbm %s1552_s1, 2048 }
   0x4   :  { %s35_s10 = sshll.u32 %s1378_s30, 4  ;;  %p1239_p0 = scmp.ne.s32.totalorder %s1552_s1, %s1238_s13  ;;  %s36_s10 = int_to_ptr.vmem [resolvable:$true] %s35_s10 }
   0x5   :  { %p1242_p1 = scmp.lt.u32.totalorder %s1238_s13, %s1552_s1 }
   0x7   :  { %p1244_p2 = pnand %p1242_p1, %p1239_p0 }
   0x9   :  { %1247 = shalt.err (!%p1244_p2)
}
   0xa   :  { %s1248_s18 = scalar_lea.vmem %s36_s10, 2048  ;;  %p1253_p4 = scmp.lt.s32.totalorder %s36_s10, %s36_s10 }
   0xb   :  { %p1249_p3 = scmp.ne.s32.totalorder %s36_s10, %s1248_s18  ;;  %p1254_p5 = scmp.lt.s32.totalorder %s1248_s18, %s1248_s18 }
   0xd   :  { %p1255_p6 = por %p1254_p5, %p1253_p4 }
   0xf   :  { %p1256_p7 = pnand %p1255_p6, %p1249_p3 }
  0x11   :  { %1259 = shalt.err (!%p1256_p7)
}
  0x12   :  { %s1379_s19 = smov 128   ;;  %s1380_s20 = smov 8  }
  0x13   :  { %41 = dma.hbm_to_vmem [thread:$0]  %s1552_s1, 2048, %s36_s10, [#allocation6], %s1379_s19, %s1379_s19, %s1380_s20  }
  0x14   :  { %s1381_s23 = smov [#allocation8]   ;;  %s1382_s25 = smov [#allocation2]  }
  0x15   :  { %s63_s24 = sshll.u32 %s1381_s23, 4  ;;  %s23_s26 = sshll.u32 %s1382_s25, 4  ;;  %s64_s24 = int_to_ptr.vmem [resolvable:$true] %s63_s24  ;;  %s24_s26 = int_to_ptr.vmem [resolvable:$true] %s23_s26 }
  0x16   :  { %s1260_s29 = scalar_lea.hbm %s1556_s5, 4096 }
  0x17   :  { %p1261_p8 = scmp.ne.s32.totalorder %s1556_s5, %s1260_s29  ;;  %p1264_p9 = scmp.lt.u32.totalorder %s1260_s29, %s1556_s5 }
  0x19   :  { %p1266_p10 = pnand %p1264_p9, %p1261_p8 }
  0x1b   :  { %1269 = shalt.err (!%p1266_p10)
}
  0x1c   :  { %s1270_s1 = scalar_lea.vmem %s64_s24, 4096  ;;  %p1275_p12 = scmp.lt.s32.totalorder %s64_s24, %s64_s24 }
  0x1d   :  { %p1271_p11 = scmp.ne.s32.totalorder %s64_s24, %s1270_s1  ;;  %p1276_p13 = scmp.lt.s32.totalorder %s1270_s1, %s1270_s1 }
  0x1f   :  { %p1277_p0 = por %p1276_p13, %p1275_p12 }
  0x21   :  { %p1278_p1 = pnand %p1277_p0, %p1271_p11 }
  0x23   :  { %1281 = shalt.err (!%p1278_p1)
}
  0x24   :  { %69 = dma.hbm_to_vmem [thread:$0]  %s1556_s5, 4096, %s64_s24, [#allocation9], %s1379_s19, %s1379_s19, %s1380_s20  }
  0x25   :  { %s1282_s17 = scalar_lea.hbm %s1551_s0, 128 }
  0x26   :  { %p1283_p2 = scmp.ne.s32.totalorder %s1551_s0, %s1282_s17  ;;  %p1286_p3 = scmp.lt.u32.totalorder %s1282_s17, %s1551_s0 }
  0x28   :  { %p1288_p4 = pnand %p1286_p3, %p1283_p2 }
  0x2a   :  { %1291 = shalt.err (!%p1288_p4)
}
  0x2b   :  { %s1292_s25 = scalar_lea.vmem %s24_s26, 128  ;;  %p1297_p6 = scmp.lt.s32.totalorder %s24_s26, %s24_s26 }
  0x2c   :  { %p1293_p5 = scmp.ne.s32.totalorder %s24_s26, %s1292_s25  ;;  %p1298_p7 = scmp.lt.s32.totalorder %s1292_s25, %s1292_s25 }
  0x2e   :  { %p1299_p8 = por %p1298_p7, %p1297_p6 }
  0x30   :  { %p1300_p9 = pnand %p1299_p8, %p1293_p5 }
  0x32   :  { %1303 = shalt.err (!%p1300_p9)
}
  0x33   :  { %s1383_s5 = smov 64   ;;  %s1384_s24 = smov 4  }
  0x34   :  { %29 = dma.hbm_to_vmem [thread:$0]  %s1551_s0, 128, %s24_s26, [#allocation3], %s1383_s5, %s1383_s5, %s1384_s24  }
  0x35   :  { %s1385_s29 = smov [#allocation7]   ;;  %s1386_s11 = smov [#allocation10]  }
  0x36   :  { %s49_s30 = sshll.u32 %s1385_s29, 4  ;;  %s77_s12 = sshll.u32 %s1386_s11, 4  ;;  %s50_s30 = int_to_ptr.vmem [resolvable:$true] %s49_s30  ;;  %s78_s12 = int_to_ptr.vmem [resolvable:$true] %s77_s12 }
  0x37   :  { %s1304_s10 = scalar_lea.hbm %s1554_s3, 4096 }
  0x38   :  { %p1305_p10 = scmp.ne.s32.totalorder %s1554_s3, %s1304_s10  ;;  %p1308_p11 = scmp.lt.u32.totalorder %s1304_s10, %s1554_s3 }
  0x3a   :  { %p1310_p12 = pnand %p1308_p11, %p1305_p10 }
  0x3c   :  { %1313 = shalt.err (!%p1310_p12)
}
  0x3d   :  { %s1314_s0 = scalar_lea.vmem %s50_s30, 4096  ;;  %p1319_p0 = scmp.lt.s32.totalorder %s50_s30, %s50_s30 }
  0x3e   :  { %p1315_p13 = scmp.ne.s32.totalorder %s50_s30, %s1314_s0  ;;  %p1320_p1 = scmp.lt.s32.totalorder %s1314_s0, %s1314_s0 }
  0x40   :  { %p1321_p2 = por %p1320_p1, %p1319_p0 }
  0x42   :  { %p1322_p3 = pnand %p1321_p2, %p1315_p13 }
  0x44   :  { %1325 = shalt.err (!%p1322_p3)
}
  0x45   :  { %55 = dma.hbm_to_vmem [thread:$0]  %s1554_s3, 4096, %s50_s30, [#allocation6], %s1379_s19, %s1379_s19, %s1380_s20  }
  0x46   :  { %s1326_s23 = scalar_lea.hbm %s1558_s7, 2048 }
  0x47   :  { %p1327_p4 = scmp.ne.s32.totalorder %s1558_s7, %s1326_s23  ;;  %p1330_p5 = scmp.lt.u32.totalorder %s1326_s23, %s1558_s7 }
  0x49   :  { %p1332_p6 = pnand %p1330_p5, %p1327_p4 }
  0x4b   :  { %1335 = shalt.err (!%p1332_p6)
}
  0x4c   :  { %s1336_s11 = scalar_lea.vmem %s78_s12, 2048  ;;  %p1341_p8 = scmp.lt.s32.totalorder %s78_s12, %s78_s12 }
  0x4d   :  { %p1337_p7 = scmp.ne.s32.totalorder %s78_s12, %s1336_s11  ;;  %p1342_p9 = scmp.lt.s32.totalorder %s1336_s11, %s1336_s11 }
  0x4f   :  { %p1343_p10 = por %p1342_p9, %p1341_p8 }
  0x51   :  { %p1344_p11 = pnand %p1343_p10, %p1337_p7 }
  0x53   :  { %1347 = shalt.err (!%p1344_p11)
}
  0x54   :  { %83 = dma.hbm_to_vmem [thread:$0]  %s1558_s7, 2048, %s78_s12, [#allocation9], %s1383_s5, %s1383_s5, %s1384_s24  }
  0x55   :  { %1370 = dma.done.wait [#allocation3], 128  }
  0x56   :  { %1371 = vsyncadd [#allocation3], 4294967168 }
  0x57   :  { %1372 = dma.done.wait [#allocation6], 6144  }
  0x58   :  { %1373 = vsyncadd [#allocation6], 4294961152 }
  0x59   :  { %1374 = dma.done.wait [#allocation9], 6144  }
  0x5a   :  { %1375 = vsyncadd [#allocation9], 4294961152  ;;  %v1387_v0 = vmov 0   ;;  %v1101_v1 = vld [vmem:[#allocation5 + $0x4] ss:$8 sps:$4 sm:$0xff]   ;;  %v1125_v27 = vld [vmem:[#allocation2] sm:$0xff]  }
  0x5b   :  { %250 = vmatprep.mubr.bf16.mxu0 %v1387_v0  ;;  %v1103_v2 = vld [vmem:[#allocation5] ss:$8 sps:$4 sm:$0xff]   ;;  %218 = vmatprep.subr.bf16.mxu0 %v1101_v1  ;;  %v1104_v3 = vld [vmem:[#allocation5 + $0x14] ss:$8 sps:$4 sm:$0xff]   ;;  %v1106_v4 = vld [vmem:[#allocation5 + $0x10] ss:$8 sps:$4 sm:$0xff]  }
  0x5c   :  { %219 = vmatpush1.bf16.msra.mxu0 %v1103_v2  ;;  %v1107_v5 = vld [vmem:[#allocation5 + $0x24] ss:$8 sps:$4 sm:$0xff]   ;;  %v1109_v6 = vld [vmem:[#allocation5 + $0x20] ss:$8 sps:$4 sm:$0xff]   ;;  %v1110_v7 = vld [vmem:[#allocation5 + $0x34] ss:$8 sps:$4 sm:$0xff]  }
  0x5d   :  { %220 = vmatprep.subr.bf16.mxu0 %v1104_v3  ;;  %v1112_v8 = vld [vmem:[#allocation5 + $0x30] ss:$8 sps:$4 sm:$0xff]   ;;  %v1113_v9 = vld [vmem:[#allocation5 + $0x44] ss:$8 sps:$4 sm:$0xff]   ;;  %v1128_v11 = vld [vmem:[#allocation7] ss:$8 sps:$4 sm:$0xff]  }
  0x5e   :  { %v1126_v10 = vld [vmem:[#allocation7 + $0x4] ss:$8 sps:$4 sm:$0xff]   ;;  %v1129_v12 = vld [vmem:[#allocation7 + $0x14] ss:$8 sps:$4 sm:$0xff]   ;;  %v1115_v13 = vld [vmem:[#allocation5 + $0x40] ss:$8 sps:$4 sm:$0xff]  }
  0x5f   :  { %471 = vmatprep.subr.bf16.mxu1 %v1126_v10  ;;  %v1131_v14 = vld [vmem:[#allocation7 + $0x10] ss:$8 sps:$4 sm:$0xff]   ;;  %v1116_v15 = vld [vmem:[#allocation5 + $0x54] ss:$8 sps:$4 sm:$0xff]   ;;  %v1132_v16 = vld [vmem:[#allocation7 + $0x24] ss:$8 sps:$4 sm:$0xff]  }
  0x60   :  { %221 = vmatpush1.bf16.msra.mxu0 %v1106_v4  ;;  %472 = vmatpush1.bf16.msra.mxu1 %v1128_v11  ;;  %v1118_v17 = vld [vmem:[#allocation5 + $0x50] ss:$8 sps:$4 sm:$0xff]   ;;  %v1134_v18 = vld [vmem:[#allocation7 + $0x20] ss:$8 sps:$4 sm:$0xff]   ;;  %v1119_v19 = vld [vmem:[#allocation5 + $0x64] ss:$8 sps:$4 sm:$0xff]  }
  0x61   :  { %222 = vmatprep.subr.bf16.mxu0 %v1107_v5  ;;  %473 = vmatprep.subr.bf16.mxu1 %v1129_v12  ;;  %v1135_v20 = vld [vmem:[#allocation7 + $0x34] ss:$8 sps:$4 sm:$0xff]   ;;  %v1121_v21 = vld [vmem:[#allocation5 + $0x60] ss:$8 sps:$4 sm:$0xff]   ;;  %v1137_v22 = vld [vmem:[#allocation7 + $0x30] ss:$8 sps:$4 sm:$0xff]  }
  0x62   :  { %v1122_v23 = vld [vmem:[#allocation5 + $0x74] ss:$8 sps:$4 sm:$0xff]   ;;  %v1138_v24 = vld [vmem:[#allocation7 + $0x44] ss:$8 sps:$4 sm:$0xff]   ;;  %v1124_v25 = vld [vmem:[#allocation5 + $0x70] ss:$8 sps:$4 sm:$0xff]  }
  0x63   :  { %v1140_v26 = vld [vmem:[#allocation7 + $0x40] ss:$8 sps:$4 sm:$0xff]   ;;  %v1141_v28 = vld [vmem:[#allocation7 + $0x54] ss:$8 sps:$4 sm:$0xff]   ;;  %v1143_v29 = vld [vmem:[#allocation7 + $0x50] ss:$8 sps:$4 sm:$0xff]  }
  0x64   :  { %223 = vmatpush1.bf16.msra.mxu0 %v1109_v6  ;;  %474 = vmatpush1.bf16.msra.mxu1 %v1131_v14  ;;  %v1144_v30 = vld [vmem:[#allocation7 + $0x64] ss:$8 sps:$4 sm:$0xff]   ;;  %v1146_v31 = vld [vmem:[#allocation7 + $0x60] ss:$8 sps:$4 sm:$0xff]   ;;  %v1147_v32 = vld [vmem:[#allocation7 + $0x74] ss:$8 sps:$4 sm:$0xff]   ;;  %v122_v14 = vlaneseq }
  0x65   :  { %224 = vmatprep.subr.bf16.mxu0 %v1110_v7  ;;  %475 = vmatprep.subr.bf16.mxu1 %v1132_v16  ;;  %v1149_v33 = vld [vmem:[#allocation7 + $0x70] ss:$8 sps:$4 sm:$0xff]   ;;  %v1150_v34 = vld [vmem:[#allocation7 + $0x84] ss:$8 sps:$4 sm:$0xff]   ;;  %v1152_v35 = vld [vmem:[#allocation7 + $0x80] ss:$8 sps:$4 sm:$0xff]  }
  0x66   :  { %v1153_v36 = vld [vmem:[#allocation7 + $0x94] ss:$8 sps:$4 sm:$0xff]   ;;  %v1155_v37 = vld [vmem:[#allocation7 + $0x90] ss:$8 sps:$4 sm:$0xff]   ;;  %v1156_v38 = vld [vmem:[#allocation7 + $0xa4] ss:$8 sps:$4 sm:$0xff]  }
  0x67   :  { %v1158_v39 = vld [vmem:[#allocation7 + $0xa0] ss:$8 sps:$4 sm:$0xff]   ;;  %v1159_v40 = vld [vmem:[#allocation7 + $0xb4] ss:$8 sps:$4 sm:$0xff]   ;;  %v1161_v41 = vld [vmem:[#allocation7 + $0xb0] ss:$8 sps:$4 sm:$0xff]  }
  0x68   :  { %225 = vmatpush1.bf16.msra.mxu0 %v1112_v8  ;;  %476 = vmatpush1.bf16.msra.mxu1 %v1134_v18  ;;  %v1162_v42 = vld [vmem:[#allocation7 + $0xc4] ss:$8 sps:$4 sm:$0xff]   ;;  %v1164_v43 = vld [vmem:[#allocation7 + $0xc0] ss:$8 sps:$4 sm:$0xff]   ;;  %v1165_v44 = vld [vmem:[#allocation7 + $0xd4] ss:$8 sps:$4 sm:$0xff]  }
  0x69   :  { %226 = vmatprep.subr.bf16.mxu0 %v1113_v9  ;;  %477 = vmatprep.subr.bf16.mxu1 %v1135_v20  ;;  %v1167_v45 = vld [vmem:[#allocation7 + $0xd0] ss:$8 sps:$4 sm:$0xff]   ;;  %v1168_v46 = vld [vmem:[#allocation7 + $0xe4] ss:$8 sps:$4 sm:$0xff]   ;;  %v1170_v47 = vld [vmem:[#allocation7 + $0xe0] ss:$8 sps:$4 sm:$0xff]  }
  0x6a   :  { %v1171_v48 = vld [vmem:[#allocation7 + $0xf4] ss:$8 sps:$4 sm:$0xff]   ;;  %v1173_v49 = vld [vmem:[#allocation7 + $0xf0] ss:$8 sps:$4 sm:$0xff]   ;;  %v1174_v50 = vld [vmem:[#allocation8] ss:$8 sps:$4 sm:$0xff]  }
  0x6b   :  { %v1176_v51 = vld [vmem:[#allocation8 + $0x4] ss:$8 sps:$4 sm:$0xff]   ;;  %v1179_v52 = vld [vmem:[#allocation8 + $0x14] ss:$8 sps:$4 sm:$0xff]   ;;  %v1177_v53 = vld [vmem:[#allocation8 + $0x10] ss:$8 sps:$4 sm:$0xff]  }
  0x6c   :  { %227 = vmatpush1.bf16.msra.mxu0 %v1115_v13  ;;  %478 = vmatpush1.bf16.msra.mxu1 %v1137_v22  ;;  %v1182_v54 = vld [vmem:[#allocation8 + $0x24] ss:$8 sps:$4 sm:$0xff]   ;;  %v1180_v55 = vld [vmem:[#allocation8 + $0x20] ss:$8 sps:$4 sm:$0xff]   ;;  %v1185_v56 = vld [vmem:[#allocation8 + $0x34] ss:$8 sps:$4 sm:$0xff]  }
  0x6d   :  { %228 = vmatprep.subr.bf16.mxu0 %v1116_v15  ;;  %479 = vmatprep.subr.bf16.mxu1 %v1138_v24  ;;  %v1183_v57 = vld [vmem:[#allocation8 + $0x30] ss:$8 sps:$4 sm:$0xff]   ;;  %v1188_v58 = vld [vmem:[#allocation8 + $0x44] ss:$8 sps:$4 sm:$0xff]   ;;  %v1186_v59 = vld [vmem:[#allocation8 + $0x40] ss:$8 sps:$4 sm:$0xff]  }
  0x6e   :  { %v1191_v60 = vld [vmem:[#allocation8 + $0x54] ss:$8 sps:$4 sm:$0xff]   ;;  %v1189_v61 = vld [vmem:[#allocation8 + $0x50] ss:$8 sps:$4 sm:$0xff]   ;;  %v1194_v62 = vld [vmem:[#allocation8 + $0x64] ss:$8 sps:$4 sm:$0xff]  }
  0x6f   :  { %v1192_v63 = vld [vmem:[#allocation8 + $0x60] ss:$8 sps:$4 sm:$0xff]   ;;  %v1197_v0 = vld [vmem:[#allocation8 + $0x74] ss:$8 sps:$4 sm:$0xff]   ;;  %v1195_v1 = vld [vmem:[#allocation8 + $0x70] ss:$8 sps:$4 sm:$0xff]  }
  0x70   :  { %229 = vmatpush1.bf16.msra.mxu0 %v1118_v17  ;;  %480 = vmatpush1.bf16.msra.mxu1 %v1140_v26  ;;  %v1200_v2 = vld [vmem:[#allocation8 + $0x84] ss:$8 sps:$4 sm:$0xff]   ;;  %v1198_v3 = vld [vmem:[#allocation8 + $0x80] ss:$8 sps:$4 sm:$0xff]   ;;  %v1203_v4 = vld [vmem:[#allocation8 + $0x94] ss:$8 sps:$4 sm:$0xff]  }
  0x71   :  { %230 = vmatprep.subr.bf16.mxu0 %v1119_v19  ;;  %481 = vmatprep.subr.bf16.mxu1 %v1141_v28  ;;  %v1201_v5 = vld [vmem:[#allocation8 + $0x90] ss:$8 sps:$4 sm:$0xff]   ;;  %v1206_v6 = vld [vmem:[#allocation8 + $0xa4] ss:$8 sps:$4 sm:$0xff]   ;;  %v1204_v7 = vld [vmem:[#allocation8 + $0xa0] ss:$8 sps:$4 sm:$0xff]  }
  0x72   :  { %v1209_v8 = vld [vmem:[#allocation8 + $0xb4] ss:$8 sps:$4 sm:$0xff]   ;;  %v1207_v9 = vld [vmem:[#allocation8 + $0xb0] ss:$8 sps:$4 sm:$0xff]   ;;  %v1212_v10 = vld [vmem:[#allocation8 + $0xc4] ss:$8 sps:$4 sm:$0xff]  }
  0x73   :  { %v1210_v11 = vld [vmem:[#allocation8 + $0xc0] ss:$8 sps:$4 sm:$0xff]   ;;  %v1215_v12 = vld [vmem:[#allocation8 + $0xd4] ss:$8 sps:$4 sm:$0xff]   ;;  %v1213_v13 = vld [vmem:[#allocation8 + $0xd0] ss:$8 sps:$4 sm:$0xff]  }
  0x74   :  { %231 = vmatpush1.bf16.msra.mxu0 %v1121_v21  ;;  %482 = vmatpush1.bf16.msra.mxu1 %v1143_v29  ;;  %v123_v15 = vshrl.u32 %v122_v14, 7  ;;  %v120_v17 = vld [vmem:[%s1553_s2] sm:$0x3]  ;;  %s1388_s1 = smov [#allocation11]  }
  0x75   :  { %232 = vmatprep.subr.bf16.mxu0 %v1122_v23  ;;  %483 = vmatprep.subr.bf16.mxu1 %v1144_v30  ;;  %s956_s10 = sshll.u32 %s1388_s1, 4  ;;  %s957_s10 = int_to_ptr.vmem [resolvable:$true] %s956_s10 }
  0x76   :  { %v1514_v16 = vsub.s32 0, %v123_v15  ;;  %v1519_v18 = vsub.s32 1, %v123_v15  ;;  %s1348_s14 = scalar_lea.vmem %s957_s10, 256  ;;  %p1353_p13 = scmp.lt.s32.totalorder %s957_s10, %s957_s10 }
  0x77   :  { %p1349_p12 = scmp.ne.s32.totalorder %s957_s10, %s1348_s14  ;;  %p1354_p0 = scmp.lt.s32.totalorder %s1348_s14, %s1348_s14 }
  0x78   :  { %233 = vmatpush1.bf16.msra.mxu0 %v1124_v25  ;;  %484 = vmatpush1.bf16.msra.mxu1 %v1146_v31  ;;  %v125_v19 = vrot.slane %v120_v17, %v1514_v16  ;;  %v129_v20 = vrot.slane %v120_v17, %v1519_v18 }
  0x79   :  { %485 = vmatprep.subr.bf16.mxu1 %v1147_v32  ;;  %724 = vmatprep.subr.bf16.mxu0 %v1176_v51  ;;  %p1355_p1 = por %p1354_p0, %p1353_p13 }
  0x7b   :  { %251 = vmatmul.mubr.bf16.vlgmr.msra.gmra.mrb[0].mxu0 %v1125_v27  ;;  %p1356_p2 = pnand %p1355_p1, %p1349_p12 }
  0x7c   :  { %486 = vmatpush1.bf16.msra.mxu1 %v1149_v33  ;;  %725 = vmatpush1.bf16.msra.mxu0 %v1174_v50  ;;  %v299_v50 = vld [vmem:[%s1555_s4] sm:$0x3] }
  0x7d   :  { %487 = vmatprep.subr.bf16.mxu1 %v1150_v34  ;;  %726 = vmatprep.subr.bf16.mxu0 %v1179_v52  ;;  %v304_v51 = vrot.slane %v299_v50, %v1514_v16  ;;  %v308_v52 = vrot.slane %v299_v50, %v1519_v18 }
  0x80   :  { %488 = vmatpush1.bf16.msra.mxu1 %v1152_v35  ;;  %727 = vmatpush1.bf16.msra.mxu0 %v1177_v53  ;;  %v1218_v35 = vld [vmem:[#allocation8 + $0xe4] ss:$8 sps:$4 sm:$0xff]  }
  0x81   :  { %489 = vmatprep.subr.bf16.mxu1 %v1153_v36  ;;  %728 = vmatprep.subr.bf16.mxu0 %v1182_v54  ;;  %v1216_v36 = vld [vmem:[#allocation8 + $0xe0] ss:$8 sps:$4 sm:$0xff]  }
  0x84   :  { %490 = vmatpush1.bf16.msra.mxu1 %v1155_v37  ;;  %729 = vmatpush1.bf16.msra.mxu0 %v1180_v55  ;;  %v1221_v37 = vld [vmem:[#allocation8 + $0xf4] ss:$8 sps:$4 sm:$0xff]  }
  0x85   :  { %491 = vmatprep.subr.bf16.mxu1 %v1156_v38  ;;  %730 = vmatprep.subr.bf16.mxu0 %v1185_v56  ;;  %v1219_v38 = vld [vmem:[#allocation8 + $0xf0] ss:$8 sps:$4 sm:$0xff]  }
  0x88   :  { %492 = vmatpush1.bf16.msra.mxu1 %v1158_v39  ;;  %731 = vmatpush1.bf16.msra.mxu0 %v1183_v57  ;;  %v1222_v39 = vld [vmem:[#allocation10 + $0x40] sm:$0xff]  }
  0x89   :  { %493 = vmatprep.subr.bf16.mxu1 %v1159_v40  ;;  %732 = vmatprep.subr.bf16.mxu0 %v1188_v58  ;;  %v1223_v40 = vld [vmem:[#allocation10] sm:$0xff]  }
  0x8c   :  { %494 = vmatpush1.bf16.msra.mxu1 %v1161_v41  ;;  %733 = vmatpush1.bf16.msra.mxu0 %v1186_v59  ;;  %v1224_v41 = vld [vmem:[#allocation10 + $0x48] sm:$0xff]  }
  0x8d   :  { %495 = vmatprep.subr.bf16.mxu1 %v1162_v42  ;;  %734 = vmatprep.subr.bf16.mxu0 %v1191_v60  ;;  %v1225_v42 = vld [vmem:[#allocation10 + $0x8] sm:$0xff]  }
  0x90   :  { %496 = vmatpush1.bf16.msra.mxu1 %v1164_v43  ;;  %735 = vmatpush1.bf16.msra.mxu0 %v1189_v61  ;;  %v1226_v43 = vld [vmem:[#allocation10 + $0x50] sm:$0xff]  }
  0x91   :  { %497 = vmatprep.subr.bf16.mxu1 %v1165_v44  ;;  %736 = vmatprep.subr.bf16.mxu0 %v1194_v62  ;;  %v1227_v44 = vld [vmem:[#allocation10 + $0x10] sm:$0xff]  }
  0x94   :  { %498 = vmatpush1.bf16.msra.mxu1 %v1167_v45  ;;  %737 = vmatpush1.bf16.msra.mxu0 %v1192_v63  ;;  %v1228_v45 = vld [vmem:[#allocation10 + $0x58] sm:$0xff]  }
  0x95   :  { %499 = vmatprep.subr.bf16.mxu1 %v1168_v46  ;;  %738 = vmatprep.subr.bf16.mxu0 %v1197_v0  ;;  %v1229_v46 = vld [vmem:[#allocation10 + $0x18] sm:$0xff]  }
  0x98   :  { %500 = vmatpush1.bf16.msra.mxu1 %v1170_v47  ;;  %739 = vmatpush1.bf16.msra.mxu0 %v1195_v1  ;;  %v1230_v47 = vld [vmem:[#allocation10 + $0x60] sm:$0xff]  }
  0x99   :  { %501 = vmatprep.subr.bf16.mxu1 %v1171_v48  ;;  %740 = vmatprep.subr.bf16.mxu0 %v1200_v2  ;;  %v1231_v48 = vld [vmem:[#allocation10 + $0x20] sm:$0xff]  }
  0x9c   :  { %502 = vmatpush1.bf16.msra.mxu1 %v1173_v49  ;;  %741 = vmatpush1.bf16.msra.mxu0 %v1198_v3  ;;  %v1232_v49 = vld [vmem:[#allocation10 + $0x68] sm:$0xff]  }
  0x9d   :  { %742 = vmatprep.subr.bf16.mxu0 %v1203_v4  ;;  %1068 = vmatprep.subr.bf16.mxu1 %v1222_v39  ;;  %v1233_v3 = vld [vmem:[#allocation10 + $0x28] sm:$0xff]   ;;  %v1234_v4 = vld [vmem:[#allocation10 + $0x70] sm:$0xff]  }
  0xa0   :  { %743 = vmatpush1.bf16.msra.mxu0 %v1201_v5  ;;  %v1235_v5 = vld [vmem:[#allocation10 + $0x30] sm:$0xff]  }
  0xa1   :  { %744 = vmatprep.subr.bf16.mxu0 %v1206_v6  ;;  %v1236_v6 = vld [vmem:[#allocation10 + $0x78] sm:$0xff]  }
  0xa4   :  { %745 = vmatpush1.bf16.msra.mxu0 %v1204_v7  ;;  %v1237_v7 = vld [vmem:[#allocation10 + $0x38] sm:$0xff]  }
  0xa5   :  { %746 = vmatprep.subr.bf16.mxu0 %v1209_v8  ;;  %v552_v8 = vld [vmem:[%s1557_s6] sm:$0x3] }
  0xa8   :  { %747 = vmatpush1.bf16.msra.mxu0 %v1207_v9  ;;  %v557_v9 = vrot.slane %v552_v8, %v1514_v16  ;;  %v1051_v16 = vld [vmem:[%s1559_s8] ss:$0 sm:$0xff] }
  0xa9   :  { %748 = vmatprep.subr.bf16.mxu0 %v1212_v10  ;;  %v561_v10 = vrot.slane %v552_v8, %v1519_v18 }
  0xac   :  { %749 = vmatpush1.bf16.msra.mxu0 %v1210_v11 }
  0xad   :  { %750 = vmatprep.subr.bf16.mxu0 %v1215_v12 }
  0xb0   :  { %751 = vmatpush1.bf16.msra.mxu0 %v1213_v13 }
  0xb1   :  { %752 = vmatprep.subr.bf16.mxu0 %v1218_v35 }
  0xb4   :  { %753 = vmatpush1.bf16.msra.mxu0 %v1216_v36 }
  0xb5   :  { %754 = vmatprep.subr.bf16.mxu0 %v1221_v37 }
  0xb8   :  { %755 = vmatpush1.bf16.msra.mxu0 %v1219_v38 }
 0x14e   :  { %v252_v21 = vpop.f32.mrb[0].mxu0 }
 0x14f   :  { %v253_v22 = vadd.f32 %v252_v21, %v125_v19  ;;  %v254_v23 = vpop.f32.mrb[1].mxu0 }
 0x150   :  { %v255_v24 = vadd.f32 %v254_v23, %v129_v20  ;;  %v256_v25 = vpop.f32.mrb[2].mxu0 }
 0x151   :  { %v257_v26 = vadd.f32 %v256_v25, %v125_v19  ;;  %v258_v27 = vpop.f32.mrb[3].mxu0  ;;  %v261_v29 = vmax.f32 %v253_v22, 0.0 }
 0x152   :  { %v259_v28 = vadd.f32 %v258_v27, %v129_v20  ;;  %v262_v31 = vmax.f32 %v255_v24, 0.0 }
 0x153   :  { %v263_v30 = vmax.f32 %v257_v26, 0.0 }
 0x154   :  { %v264_v32 = vmax.f32 %v259_v28, 0.0 }
 0x155   :  { %v265_v33 = vpack.c.bf16 %v263_v30, %v261_v29 }
 0x156   :  { %v266_v34 = vpack.c.bf16 %v264_v32, %v262_v31 }
 0x158   :  { %503 = vmatprep.mubr.bf16.mxu1 %v266_v34 }
 0x159   :  { %504 = vmatmul.mubr.bf16.vlgmr.msra.gmra.mrb[0].mxu1 %v265_v33 }
 0x15a   :  { %1069 = vmatpush3.bf16.msra.mxu1 %v1223_v40 }
 0x15b   :  { %1070 = vmatprep.subr.bf16.mxu1 %v1224_v41 }
 0x15e   :  { %1071 = vmatpush3.bf16.msra.mxu1 %v1225_v42 }
 0x15f   :  { %1072 = vmatprep.subr.bf16.mxu1 %v1226_v43 }
 0x162   :  { %1073 = vmatpush3.bf16.msra.mxu1 %v1227_v44 }
 0x163   :  { %1074 = vmatprep.subr.bf16.mxu1 %v1228_v45 }
 0x166   :  { %1075 = vmatpush3.bf16.msra.mxu1 %v1229_v46 }
 0x167   :  { %1076 = vmatprep.subr.bf16.mxu1 %v1230_v47 }
 0x16a   :  { %1077 = vmatpush3.bf16.msra.mxu1 %v1231_v48 }
 0x16b   :  { %1078 = vmatprep.subr.bf16.mxu1 %v1232_v49 }
 0x16e   :  { %1079 = vmatpush3.bf16.msra.mxu1 %v1233_v3 }
 0x16f   :  { %1080 = vmatprep.subr.bf16.mxu1 %v1234_v4 }
 0x172   :  { %1081 = vmatpush3.bf16.msra.mxu1 %v1235_v5 }
 0x173   :  { %1082 = vmatprep.subr.bf16.mxu1 %v1236_v6 }
 0x176   :  { %1083 = vmatpush3.bf16.msra.mxu1 %v1237_v7 }
 0x22c   :  { %v505_v53 = vpop.f32.mrb[0].mxu1 }
 0x22d   :  { %v506_v54 = vadd.f32 %v505_v53, %v304_v51  ;;  %v507_v55 = vpop.f32.mrb[1].mxu1 }
 0x22e   :  { %v508_v56 = vadd.f32 %v507_v55, %v308_v52  ;;  %v509_v57 = vpop.f32.mrb[2].mxu1 }
 0x22f   :  { %v510_v58 = vadd.f32 %v509_v57, %v304_v51  ;;  %v511_v59 = vpop.f32.mrb[3].mxu1  ;;  %v514_v61 = vmax.f32 %v506_v54, 0.0 }
 0x230   :  { %v512_v60 = vadd.f32 %v511_v59, %v308_v52  ;;  %v515_v63 = vmax.f32 %v508_v56, 0.0 }
 0x231   :  { %v516_v62 = vmax.f32 %v510_v58, 0.0 }
 0x232   :  { %v517_v0 = vmax.f32 %v512_v60, 0.0 }
 0x233   :  { %v518_v1 = vpack.c.bf16 %v516_v62, %v514_v61 }
 0x234   :  { %v519_v2 = vpack.c.bf16 %v517_v0, %v515_v63 }
 0x236   :  { %756 = vmatprep.mubr.bf16.mxu0 %v519_v2 }
 0x237   :  { %757 = vmatmul.mubr.bf16.vlgmr.msra.gmra.mrb[4].mxu0 %v518_v1 }
 0x30a   :  { %v758_v11 = vpop.f32.mrb[4].mxu0 }
 0x30b   :  { %v759_v12 = vadd.f32 %v758_v11, %v557_v9  ;;  %v760_v13 = vpop.f32.mrb[5].mxu0 }
 0x30c   :  { %v761_v14 = vadd.f32 %v760_v13, %v561_v10  ;;  %v762_v15 = vpop.f32.mrb[6].mxu0 }
 0x30d   :  { %v763_v17 = vadd.f32 %v762_v15, %v557_v9  ;;  %v764_v19 = vpop.f32.mrb[7].mxu0  ;;  %v767_v21 = vmax.f32 %v759_v12, 0.0 }
 0x30e   :  { %v765_v20 = vadd.f32 %v764_v19, %v561_v10  ;;  %v768_v23 = vmax.f32 %v761_v14, 0.0 }
 0x30f   :  { %v769_v22 = vmax.f32 %v763_v17, 0.0 }
 0x310   :  { %v770_v24 = vmax.f32 %v765_v20, 0.0 }
 0x311   :  { %v771_v25 = vpack.c.bf16 %v769_v22, %v767_v21 }
 0x312   :  { %v772_v26 = vpack.c.bf16 %v770_v24, %v768_v23 }
 0x314   :  { %940 = vmatprep.mubr.bf16.mxu1 %v772_v26 }
 0x315   :  { %941 = vmatmul.mubr.bf16.vlgmr.msra.gmra.mrb[4].mxu1 %v771_v25 }
 0x3e8   :  { %v1084_v27 = vpop.f32.mrb[4].mxu1 }
 0x3e9   :  { %v1085_v18 = vpop.f32.mrb[5].mxu1 }
 0x3ea   :  { %v1086_v28 = vadd.f32 %v1085_v18, %v1084_v27  ;;  %v1087_v29 = vpop.f32.mrb[6].mxu1 }
 0x3eb   :  { %v1088_v30 = vpop.f32.mrb[7].mxu1 }
 0x3ec   :  { %v943_v31 = vadd.f32 %v1086_v28, %v1051_v16  ;;  %v1089_v32 = vadd.f32 %v1088_v30, %v1087_v29 }
 0x3ee   :  { %949 = vst [vmem:[#allocation11] sm:$0xff] %v943_v31  ;;  %v946_v33 = vadd.f32 %v1089_v32, %v1051_v16 }
 0x3f0   :  { %950 = vst [vmem:[#allocation11 + $0x8] sm:$0xff] %v946_v33 }
 0x3f1   :  { %1359 = shalt.err (!%p1356_p2)
}
 0x3f2   :  { %s1360_s16 = scalar_lea.hbm %s1560_s9, 256 }
 0x3f3   :  { %p1361_p3 = scmp.ne.s32.totalorder %s1560_s9, %s1360_s16  ;;  %p1364_p4 = scmp.lt.u32.totalorder %s1360_s16, %s1560_s9 }
 0x3f5   :  { %p1366_p5 = pnand %p1364_p4, %p1361_p3 }
 0x3f7   :  { %1369 = shalt.err (!%p1366_p5)
}
 0x3f8   :  { %962 = dma.vmem_to_hbm [thread:$0]  %s957_s10, 256, %s1560_s9, [#allocation4], %s1379_s19, %s1379_s19, %s1380_s20  }
 0x3f9   :  { %1376 = dma.done.wait [#allocation4], 256  }
 0x3fa   :  { %1377 = vsyncadd [#allocation4], 4294967040 }
 0x3fb   :  { %966 = vsyncpa [#allocation3], 1 }
 0x3fc   :  { %967 = vsyncpa [#allocation6], 1 }
 0x3fd   :  { %968 = vsyncpa [#allocation9], 1 }
 0x3fe   :  { %969 = vsyncpa [#allocation4], 1 }

</bundles_post_ra>
